<compile_context>
chip_gen: v6e
topology: v6e:2x2x1
jax: 0.10.0
libtpu: 0.0.40
codegen_flags: <defaults>
</compile_context>

<pallas_src>
import functools

import jax
import jax.numpy as jnp
from jax.experimental import pallas as pl
from jax.experimental.pallas import tpu as pltpu

_BF16 = jnp.bfloat16


def _round_up(x, m):
    return ((x + m - 1) // m) * m


def _epilogue_dtype():
    """bf16 VPU/EUP exists on v6e/v7x; v5e (and older) lack it -> f32 there."""
    try:
        kind = jax.devices()[0].device_kind.lower()
    except Exception:
        return jnp.float32
    if any(tag in kind for tag in ("v2", "v3", "v4", "v5")):
        return jnp.float32
    return _BF16


# ----------------------------------------------------------------------------
# Pallas kernel: fused (RAG stand-in proj + tanh) -> encoder -> decoder
# ----------------------------------------------------------------------------
def _mlp_kernel(x_ref,
                wp_ref,
                w1_ref, b1_ref,
                w2_ref, b2_ref,
                w34_ref, b34_ref,
                w5_ref, b5_ref,
                w6_ref, b6_ref,
                out_ref, *, ep_dtype):
    # RAG stand-in projection + tanh, fused into the kernel (no HBM round trip
    # of the [B, hidden] representation).
    x = x_ref[...].astype(_BF16)
    rep = jnp.tanh(jnp.dot(x, wp_ref[...], preferred_element_type=jnp.float32))
    h = rep.astype(_BF16)

    def layer(h_bf16, w_ref, b_ref):
        # bf16 MXU inputs, f32 accumulation; bias + ReLU epilogue in ep_dtype
        # (bf16 on v6e/v7x, f32 on v5e) -- numerically identical bf16 feeds
        # the next dot either way.
        acc = jnp.dot(h_bf16, w_ref[...], preferred_element_type=jnp.float32)
        return jnp.maximum((acc + b_ref[...]).astype(ep_dtype), 0).astype(_BF16)

    h = layer(h, w1_ref, b1_ref)     # encoder L1 + ReLU
    h = layer(h, w2_ref, b2_ref)     # encoder L2 + ReLU
    h = layer(h, w34_ref, b34_ref)   # encoder L3 + decoder L1 (fused) + ReLU
    h = layer(h, w5_ref, b5_ref)     # decoder L2 + ReLU

    out = jnp.dot(h, w6_ref[...], preferred_element_type=jnp.float32) + b6_ref[...]
    out_ref[...] = out.astype(out_ref.dtype)


# ----------------------------------------------------------------------------
# One-time operand preparation (fusion, bf16 cast, lane padding)
# ----------------------------------------------------------------------------
def prepare_operands(params, rag_proj, out_dim):
    """Pre-fuse w3@w4, cast weights to bf16, pad output features to 128."""
    w34 = params["w3"] @ params["w4"]                       # (H, H)
    b34 = params["b3"] @ params["w4"] + params["b4"]        # (1, H)

    out_dim_pad = _round_up(out_dim, 128)   # lane-dense (unmasked) stores
    w6 = params["w6"]
    b6 = params["b6"]
    if out_dim_pad != out_dim:
        w6 = jnp.pad(w6, ((0, 0), (0, out_dim_pad - out_dim)))
        b6 = jnp.pad(b6, ((0, 0), (0, out_dim_pad - out_dim)))

    ops = (
        rag_proj.astype(_BF16),
        params["w1"].astype(_BF16), params["b1"].astype(jnp.float32),
        params["w2"].astype(_BF16), params["b2"].astype(jnp.float32),
        w34.astype(_BF16), b34.astype(jnp.float32),
        params["w5"].astype(_BF16), params["b5"].astype(jnp.float32),
        w6.astype(_BF16), b6.astype(jnp.float32),
    )
    return ops, out_dim_pad


# ----------------------------------------------------------------------------
# Tiling / VMEM-budget helpers
# ----------------------------------------------------------------------------
def _pick_m_tile(B):
    """Batch-tile rows.

    Tiny batches: a single grid step (everything resident; splitting a serial
    six-dot chain only adds per-step overhead).  Large batches: the largest
    tile in {256, 512, 1024, 2048} that still leaves >= 2 grid steps so the
    "parallel" axis shards across v7x's two TensorCores; 2048 keeps the
    per-core footprint comfortably inside v7x's 64 MiB VMEM.
    """
    if B <= 256:
        return _round_up(B, 8)
    m_tile = 128
    for cand in (256, 512, 1024, 2048):
        if B >= 2 * cand:
            m_tile = cand
    return m_tile


def _vmem_limit_bytes(m_tile, in_dim, out_dim_pad, hidden_dim, weight_bytes):
    io = 2 * m_tile * (in_dim + out_dim_pad) * 4      # double-buffered x/out tiles (f32)
    acts = 8 * m_tile * hidden_dim * 4                # live intermediates (generous)
    need = 2 * weight_bytes + io + acts               # weights double-buffered by default
    limit = 2 * need + (4 << 20)                      # 2x headroom + slack
    return int(max(32 << 20, min(limit, 56 << 20)))   # 56 MiB ceiling: safe on v7x too


# ----------------------------------------------------------------------------
# Pallas wrapper
# ----------------------------------------------------------------------------
def gemma2b_rag_3b_mlp(x_flat, ops, out_dim_pad):
    """x_flat: [B, G*S] f32 -> [B, out_dim_pad] f32 via the fused kernel."""
    B, in_dim = x_flat.shape
    hidden_dim = ops[1].shape[0]

    m_tile = _pick_m_tile(B)
    b_pad = _round_up(B, m_tile)
    if b_pad != B:
        x_flat = jnp.pad(x_flat, ((0, b_pad - B), (0, 0)))
    grid = (b_pad // m_tile,)

    weight_bytes = sum(int(o.size) * o.dtype.itemsize for o in ops)

    x_spec = pl.BlockSpec((m_tile, in_dim), lambda i: (i, 0))
    # Constant index_map: weights/biases are DMA'd once and stay VMEM-resident
    # across all batch tiles.
    w_specs = [pl.BlockSpec(o.shape, lambda i: (0, 0)) for o in ops]
    out_spec = pl.BlockSpec((m_tile, out_dim_pad), lambda i: (i, 0))

    kernel = functools.partial(_mlp_kernel, ep_dtype=_epilogue_dtype())

    out = pl.pallas_call(
        kernel,
        out_shape=jax.ShapeDtypeStruct((b_pad, out_dim_pad), jnp.float32),
        grid_spec=pltpu.PrefetchScalarGridSpec(
            num_scalar_prefetch=0,
            grid=grid,
            in_specs=[x_spec] + w_specs,
            out_specs=out_spec,
        ),
        compiler_params=pltpu.CompilerParams(
            dimension_semantics=("parallel",),
            vmem_limit_bytes=_vmem_limit_bytes(
                m_tile, in_dim, out_dim_pad, hidden_dim, weight_bytes),
        ),
    )(x_flat, *ops)
    return out[:B]


def forward(X, ops, out_dim_pad, num_genes, num_samples):
    """Full forward matching the PyTorch module's semantics.

    X: [B, num_genes, num_samples] float32
    returns X_hat: [B, num_genes, num_samples] float32
    """
    B = X.shape[0]
    X_flat = X.reshape(B, -1)                               # X.view(X.size(0), -1)
    # TODO(synk): facebook/rag-token-base (tokenizer + RagModel) has no Pallas
    # equivalent; the [B, hidden_dim] CLS representation is replaced by a
    # deterministic tanh(X_flat @ rag_proj) stand-in (fused into the kernel).
    out = gemma2b_rag_3b_mlp(X_flat, ops, out_dim_pad)      # [B, out_dim_pad]
    out = out[:, : num_genes * num_samples]
    return out.reshape(B, num_genes, num_samples)


# ----------------------------------------------------------------------------
# Deterministic parameter construction (synthetic; no checkpoint load)
# ----------------------------------------------------------------------------
def init_params(key, num_genes, num_samples, latent_dim, hidden_dim):
    dims = [
        (hidden_dim, hidden_dim),               # encoder L1
        (hidden_dim, hidden_dim),               # encoder L2
        (hidden_dim, latent_dim),               # encoder L3
        (latent_dim, hidden_dim),               # decoder L1
        (hidden_dim, hidden_dim),               # decoder L2
        (hidden_dim, num_genes * num_samples),  # decoder L3
    ]
    params = {}
    keys = jax.random.split(key, 2 * len(dims))
    for i, (din, dout) in enumerate(dims):
        scale = 1.0 / jnp.sqrt(jnp.float32(din))
        params[f"w{i+1}"] = scale * jax.random.normal(
            keys[2 * i], (din, dout), dtype=jnp.float32)
        params[f"b{i+1}"] = 0.01 * jax.random.normal(
            keys[2 * i + 1], (1, dout), dtype=jnp.float32)
    return params


# ----------------------------------------------------------------------------
# References:
#   * _matched: mirrors the kernel's numerics (bf16 MXU inputs, f32 acc,
#     fused W34) -> tight tolerance.
#   * _f32: the true un-fused fp32 graph of the PyTorch module (with the
#     tanh(X @ rag_proj) stand-in for RAG) -> loose tolerance; guards against
#     the "circular reference" concern.
# ----------------------------------------------------------------------------
def reference_forward_matched(X, params, rag_proj, num_genes, num_samples):
    B = X.shape[0]
    x = X.reshape(B, -1).astype(_BF16)
    rep = jnp.tanh(jnp.dot(x, rag_proj.astype(_BF16),
                           preferred_element_type=jnp.float32))
    w34 = params["w3"] @ params["w4"]
    b34 = params["b3"] @ params["w4"] + params["b4"]

    def layer(h, w, b):
        acc = jnp.dot(h.astype(_BF16), w.astype(_BF16),
                      preferred_element_type=jnp.float32) + b
        return jnp.maximum(acc, 0.0)

    h = layer(rep, params["w1"], params["b1"])
    h = layer(h, params["w2"], params["b2"])
    h = layer(h, w34, b34)
    h = layer(h, params["w5"], params["b5"])
    out = jnp.dot(h.astype(_BF16), params["w6"].astype(_BF16),
                  preferred_element_type=jnp.float32) + params["b6"]
    return out.reshape(B, num_genes, num_samples)


def reference_forward_f32(X, params, rag_proj, num_genes, num_samples):
    B = X.shape[0]
    rep = jnp.tanh(X.reshape(B, -1) @ rag_proj)
    h = jnp.maximum(rep @ params["w1"] + params["b1"], 0.0)
    h = jnp.maximum(h @ params["w2"] + params["b2"], 0.0)
    z = h @ params["w3"] + params["b3"]                       # latent (no ReLU)
    h = jnp.maximum(z @ params["w4"] + params["b4"], 0.0)
    h = jnp.maximum(h @ params["w5"] + params["b5"], 0.0)
    out = h @ params["w6"] + params["b6"]
    return out.reshape(B, num_genes, num_samples)


if __name__ == "__main__":
    # Small shapes consistent with the module's forward.
    batch = 2
    num_genes = 16
    num_samples = 8
    hidden_dim = 256
    latent_dim = 128

    key = jax.random.PRNGKey(0)
    k_x, k_proj, k_params, k_x2 = jax.random.split(key, 4)

    X = jax.random.normal(k_x, (batch, num_genes, num_samples),
                          dtype=jnp.float32)
    rag_proj = (1.0 / jnp.sqrt(jnp.float32(num_genes * num_samples))) * \
        jax.random.normal(k_proj, (num_genes * num_samples, hidden_dim),
                          dtype=jnp.float32)
    params = init_params(k_params, num_genes, num_samples,
                         latent_dim, hidden_dim)

    ops, out_dim_pad = prepare_operands(params, rag_proj,
                                        num_genes * num_samples)

    # --- run 1: tiny batch (single grid step, overhead-bound path) ----------
    X_hat = forward(X, ops, out_dim_pad, num_genes, num_samples)
    X_hat = jax.block_until_ready(X_hat)
    assert X_hat.shape == (batch, num_genes, num_samples)

    ref_m = reference_forward_matched(X, params, rag_proj,
                                      num_genes, num_samples)
    ref_f = reference_forward_f32(X, params, rag_proj,
                                  num_genes, num_samples)
    err_m = float(jnp.max(jnp.abs(X_hat - ref_m)))
    err_f = float(jnp.max(jnp.abs(X_hat - ref_f)))
    assert jnp.allclose(X_hat, ref_m, atol=2e-2, rtol=2e-2), err_m
    assert jnp.allclose(X_hat, ref_f, atol=1e-1, rtol=1e-1), err_f

    # --- run 2: multi-tile batch (exercises the >=2-step "parallel" grid) ---
    big_batch = 384
    X2 = jax.random.normal(k_x2, (big_batch, num_genes, num_samples),
                           dtype=jnp.float32)
    X2_hat = jax.block_until_ready(
        forward(X2, ops, out_dim_pad, num_genes, num_samples))
    assert X2_hat.shape == (big_batch, num_genes, num_samples)
    ref2 = reference_forward_matched(X2, params, rag_proj,
                                     num_genes, num_samples)
    err2 = float(jnp.max(jnp.abs(X2_hat - ref2)))
    assert jnp.allclose(X2_hat, ref2, atol=2e-2, rtol=2e-2), err2

    print("KERNEL_OK")
</pallas_src>

<mosaic_0001>
module attributes {stable_mosaic.version = 11 : i64} {
  func.func @_mlp_kernel(%arg0: i32, %arg1: memref<8x128xf32, #tpu.memory_space<vmem>>, %arg2: memref<128x256xbf16, #tpu.memory_space<vmem>>, %arg3: memref<256x256xbf16, #tpu.memory_space<vmem>>, %arg4: memref<1x256xf32, #tpu.memory_space<vmem>>, %arg5: memref<256x256xbf16, #tpu.memory_space<vmem>>, %arg6: memref<1x256xf32, #tpu.memory_space<vmem>>, %arg7: memref<256x256xbf16, #tpu.memory_space<vmem>>, %arg8: memref<1x256xf32, #tpu.memory_space<vmem>>, %arg9: memref<256x256xbf16, #tpu.memory_space<vmem>>, %arg10: memref<1x256xf32, #tpu.memory_space<vmem>>, %arg11: memref<256x128xbf16, #tpu.memory_space<vmem>>, %arg12: memref<1x128xf32, #tpu.memory_space<vmem>>, %arg13: memref<8x128xf32, #tpu.memory_space<vmem>>) attributes {dimension_semantics = [#tpu.dimension_semantics<parallel>], iteration_bounds = array<i64: 1>, scalar_prefetch = 0 : i64, scratch_operands = 0 : i64, tpu.core_type = #tpu.core_type<tc>, window_params = [{transform_indices = @transform_0, window_bounds = array<i64: 8, 128>}, {pipeline_mode = #tpu.pipeline_mode<synchronous>, transform_indices = @transform_1, window_bounds = array<i64: 128, 256>}, {pipeline_mode = #tpu.pipeline_mode<synchronous>, transform_indices = @transform_2, window_bounds = array<i64: 256, 256>}, {pipeline_mode = #tpu.pipeline_mode<synchronous>, transform_indices = @transform_3, window_bounds = array<i64: 1, 256>}, {pipeline_mode = #tpu.pipeline_mode<synchronous>, transform_indices = @transform_4, window_bounds = array<i64: 256, 256>}, {pipeline_mode = #tpu.pipeline_mode<synchronous>, transform_indices = @transform_5, window_bounds = array<i64: 1, 256>}, {pipeline_mode = #tpu.pipeline_mode<synchronous>, transform_indices = @transform_6, window_bounds = array<i64: 256, 256>}, {pipeline_mode = #tpu.pipeline_mode<synchronous>, transform_indices = @transform_7, window_bounds = array<i64: 1, 256>}, {pipeline_mode = #tpu.pipeline_mode<synchronous>, transform_indices = @transform_8, window_bounds = array<i64: 256, 256>}, {pipeline_mode = #tpu.pipeline_mode<synchronous>, transform_indices = @transform_9, window_bounds = array<i64: 1, 256>}, {pipeline_mode = #tpu.pipeline_mode<synchronous>, transform_indices = @transform_10, window_bounds = array<i64: 256, 128>}, {pipeline_mode = #tpu.pipeline_mode<synchronous>, transform_indices = @transform_11, window_bounds = array<i64: 1, 128>}, {transform_indices = @transform_12, window_bounds = array<i64: 8, 128>}]} {
    %c0 = arith.constant 0 : index
    %c0_0 = arith.constant 0 : index
    %0 = vector.load %arg1[%c0, %c0_0] : memref<8x128xf32, #tpu.memory_space<vmem>>, vector<8x128xf32>
    %1 = arith.truncf %0 : vector<8x128xf32> to vector<8x128xbf16>
    %c0_1 = arith.constant 0 : index
    %c0_2 = arith.constant 0 : index
    %2 = vector.load %arg2[%c0_1, %c0_2] : memref<128x256xbf16, #tpu.memory_space<vmem>>, vector<128x256xbf16>
    %cst = arith.constant dense<0.000000e+00> : vector<8x256xf32>
    %3 = tpu.matmul %1, %2, %cst {dimension_numbers = #tpu.dot_dimension_numbers<[1], [0], [0], [1], [0, 0, 1, 1], [], []>} : vector<8x128xbf16>, vector<128x256xbf16>, vector<8x256xf32> -> vector<8x256xf32>
    %4 = math.tanh %3 : vector<8x256xf32>
    %5 = arith.truncf %4 : vector<8x256xf32> to vector<8x256xbf16>
    %c0_3 = arith.constant 0 : index
    %c0_4 = arith.constant 0 : index
    %6 = vector.load %arg3[%c0_3, %c0_4] : memref<256x256xbf16, #tpu.memory_space<vmem>>, vector<256x256xbf16>
    %cst_5 = arith.constant dense<0.000000e+00> : vector<8x256xf32>
    %7 = tpu.matmul %5, %6, %cst_5 {dimension_numbers = #tpu.dot_dimension_numbers<[1], [0], [0], [1], [0, 0, 1, 1], [], []>} : vector<8x256xbf16>, vector<256x256xbf16>, vector<8x256xf32> -> vector<8x256xf32>
    %c0_6 = arith.constant 0 : index
    %c0_7 = arith.constant 0 : index
    %8 = vector.load %arg4[%c0_6, %c0_7] : memref<1x256xf32, #tpu.memory_space<vmem>>, vector<1x256xf32>
    %9 = vector.broadcast %8 : vector<1x256xf32> to vector<8x256xf32>
    %10 = arith.addf %7, %9 : vector<8x256xf32>
    %11 = arith.truncf %10 : vector<8x256xf32> to vector<8x256xbf16>
    %cst_8 = arith.constant 0.000000e+00 : bf16
    %12 = vector.broadcast %cst_8 : bf16 to vector<8x256xbf16>
    %13 = arith.maximumf %11, %12 : vector<8x256xbf16>
    %c0_9 = arith.constant 0 : index
    %c0_10 = arith.constant 0 : index
    %14 = vector.load %arg5[%c0_9, %c0_10] : memref<256x256xbf16, #tpu.memory_space<vmem>>, vector<256x256xbf16>
    %cst_11 = arith.constant dense<0.000000e+00> : vector<8x256xf32>
    %15 = tpu.matmul %13, %14, %cst_11 {dimension_numbers = #tpu.dot_dimension_numbers<[1], [0], [0], [1], [0, 0, 1, 1], [], []>} : vector<8x256xbf16>, vector<256x256xbf16>, vector<8x256xf32> -> vector<8x256xf32>
    %c0_12 = arith.constant 0 : index
    %c0_13 = arith.constant 0 : index
    %16 = vector.load %arg6[%c0_12, %c0_13] : memref<1x256xf32, #tpu.memory_space<vmem>>, vector<1x256xf32>
    %17 = vector.broadcast %16 : vector<1x256xf32> to vector<8x256xf32>
    %18 = arith.addf %15, %17 : vector<8x256xf32>
    %19 = arith.truncf %18 : vector<8x256xf32> to vector<8x256xbf16>
    %cst_14 = arith.constant 0.000000e+00 : bf16
    %20 = vector.broadcast %cst_14 : bf16 to vector<8x256xbf16>
    %21 = arith.maximumf %19, %20 : vector<8x256xbf16>
    %c0_15 = arith.constant 0 : index
    %c0_16 = arith.constant 0 : index
    %22 = vector.load %arg7[%c0_15, %c0_16] : memref<256x256xbf16, #tpu.memory_space<vmem>>, vector<256x256xbf16>
    %cst_17 = arith.constant dense<0.000000e+00> : vector<8x256xf32>
    %23 = tpu.matmul %21, %22, %cst_17 {dimension_numbers = #tpu.dot_dimension_numbers<[1], [0], [0], [1], [0, 0, 1, 1], [], []>} : vector<8x256xbf16>, vector<256x256xbf16>, vector<8x256xf32> -> vector<8x256xf32>
    %c0_18 = arith.constant 0 : index
    %c0_19 = arith.constant 0 : index
    %24 = vector.load %arg8[%c0_18, %c0_19] : memref<1x256xf32, #tpu.memory_space<vmem>>, vector<1x256xf32>
    %25 = vector.broadcast %24 : vector<1x256xf32> to vector<8x256xf32>
    %26 = arith.addf %23, %25 : vector<8x256xf32>
    %27 = arith.truncf %26 : vector<8x256xf32> to vector<8x256xbf16>
    %cst_20 = arith.constant 0.000000e+00 : bf16
    %28 = vector.broadcast %cst_20 : bf16 to vector<8x256xbf16>
    %29 = arith.maximumf %27, %28 : vector<8x256xbf16>
    %c0_21 = arith.constant 0 : index
    %c0_22 = arith.constant 0 : index
    %30 = vector.load %arg9[%c0_21, %c0_22] : memref<256x256xbf16, #tpu.memory_space<vmem>>, vector<256x256xbf16>
    %cst_23 = arith.constant dense<0.000000e+00> : vector<8x256xf32>
    %31 = tpu.matmul %29, %30, %cst_23 {dimension_numbers = #tpu.dot_dimension_numbers<[1], [0], [0], [1], [0, 0, 1, 1], [], []>} : vector<8x256xbf16>, vector<256x256xbf16>, vector<8x256xf32> -> vector<8x256xf32>
    %c0_24 = arith.constant 0 : index
    %c0_25 = arith.constant 0 : index
    %32 = vector.load %arg10[%c0_24, %c0_25] : memref<1x256xf32, #tpu.memory_space<vmem>>, vector<1x256xf32>
    %33 = vector.broadcast %32 : vector<1x256xf32> to vector<8x256xf32>
    %34 = arith.addf %31, %33 : vector<8x256xf32>
    %35 = arith.truncf %34 : vector<8x256xf32> to vector<8x256xbf16>
    %cst_26 = arith.constant 0.000000e+00 : bf16
    %36 = vector.broadcast %cst_26 : bf16 to vector<8x256xbf16>
    %37 = arith.maximumf %35, %36 : vector<8x256xbf16>
    %c0_27 = arith.constant 0 : index
    %c0_28 = arith.constant 0 : index
    %38 = vector.load %arg11[%c0_27, %c0_28] : memref<256x128xbf16, #tpu.memory_space<vmem>>, vector<256x128xbf16>
    %cst_29 = arith.constant dense<0.000000e+00> : vector<8x128xf32>
    %39 = tpu.matmul %37, %38, %cst_29 {dimension_numbers = #tpu.dot_dimension_numbers<[1], [0], [0], [1], [0, 0, 1, 1], [], []>} : vector<8x256xbf16>, vector<256x128xbf16>, vector<8x128xf32> -> vector<8x128xf32>
    %c0_30 = arith.constant 0 : index
    %c0_31 = arith.constant 0 : index
    %40 = vector.load %arg12[%c0_30, %c0_31] : memref<1x128xf32, #tpu.memory_space<vmem>>, vector<1x128xf32>
    %41 = vector.broadcast %40 : vector<1x128xf32> to vector<8x128xf32>
    %42 = arith.addf %39, %41 : vector<8x128xf32>
    %c0_32 = arith.constant 0 : index
    %c0_33 = arith.constant 0 : index
    %43 = vector.load %arg13[%c0_32, %c0_33] : memref<8x128xf32, #tpu.memory_space<vmem>>, vector<8x128xf32>
    tpu.vector_store %arg13[%c0_32, %c0_33], %42 {strides = array<i32>} : memref<8x128xf32, #tpu.memory_space<vmem>>, vector<8x128xf32>,
    return
  }
  func.func @transform_0(%arg0: i32) -> (i32, i32) {
    %c0_i32 = arith.constant 0 : i32
    %c0_i32_0 = arith.constant 0 : i32
    return %arg0, %c0_i32 : i32, i32
  }
  func.func @transform_1(%arg0: i32) -> (i32, i32) {
    %c0_i32 = arith.constant 0 : i32
    %c0_i32_0 = arith.constant 0 : i32
    %c0_i32_1 = arith.constant 0 : i32
    return %c0_i32, %c0_i32_0 : i32, i32
  }
  func.func @transform_2(%arg0: i32) -> (i32, i32) {
    %c0_i32 = arith.constant 0 : i32
    %c0_i32_0 = arith.constant 0 : i32
    %c0_i32_1 = arith.constant 0 : i32
    return %c0_i32, %c0_i32_0 : i32, i32
  }
  func.func @transform_3(%arg0: i32) -> (i32, i32) {
    %c0_i32 = arith.constant 0 : i32
    %c0_i32_0 = arith.constant 0 : i32
    %c0_i32_1 = arith.constant 0 : i32
    return %c0_i32, %c0_i32_0 : i32, i32
  }
  func.func @transform_4(%arg0: i32) -> (i32, i32) {
    %c0_i32 = arith.constant 0 : i32
    %c0_i32_0 = arith.constant 0 : i32
    %c0_i32_1 = arith.constant 0 : i32
    return %c0_i32, %c0_i32_0 : i32, i32
  }
  func.func @transform_5(%arg0: i32) -> (i32, i32) {
    %c0_i32 = arith.constant 0 : i32
    %c0_i32_0 = arith.constant 0 : i32
    %c0_i32_1 = arith.constant 0 : i32
    return %c0_i32, %c0_i32_0 : i32, i32
  }
  func.func @transform_6(%arg0: i32) -> (i32, i32) {
    %c0_i32 = arith.constant 0 : i32
    %c0_i32_0 = arith.constant 0 : i32
    %c0_i32_1 = arith.constant 0 : i32
    return %c0_i32, %c0_i32_0 : i32, i32
  }
  func.func @transform_7(%arg0: i32) -> (i32, i32) {
    %c0_i32 = arith.constant 0 : i32
    %c0_i32_0 = arith.constant 0 : i32
    %c0_i32_1 = arith.constant 0 : i32
    return %c0_i32, %c0_i32_0 : i32, i32
  }
  func.func @transform_8(%arg0: i32) -> (i32, i32) {
    %c0_i32 = arith.constant 0 : i32
    %c0_i32_0 = arith.constant 0 : i32
    %c0_i32_1 = arith.constant 0 : i32
    return %c0_i32, %c0_i32_0 : i32, i32
  }
  func.func @transform_9(%arg0: i32) -> (i32, i32) {
    %c0_i32 = arith.constant 0 : i32
    %c0_i32_0 = arith.constant 0 : i32
    %c0_i32_1 = arith.constant 0 : i32
    return %c0_i32, %c0_i32_0 : i32, i32
  }
  func.func @transform_10(%arg0: i32) -> (i32, i32) {
    %c0_i32 = arith.constant 0 : i32
    %c0_i32_0 = arith.constant 0 : i32
    %c0_i32_1 = arith.constant 0 : i32
    return %c0_i32, %c0_i32_0 : i32, i32
  }
  func.func @transform_11(%arg0: i32) -> (i32, i32) {
    %c0_i32 = arith.constant 0 : i32
    %c0_i32_0 = arith.constant 0 : i32
    %c0_i32_1 = arith.constant 0 : i32
    return %c0_i32, %c0_i32_0 : i32, i32
  }
  func.func @transform_12(%arg0: i32) -> (i32, i32) {
    %c0_i32 = arith.constant 0 : i32
    %c0_i32_0 = arith.constant 0 : i32
    return %arg0, %c0_i32 : i32, i32
  }
}

</mosaic_0001>

<bundles_post_ra>
// kernel: tpu_custom_call.1
= control target key start
LH: loop header
LB: loop body
LE: loop exit
PB: predicated region body
PF: predicated region fallthrough
CT: control target
= control target key end

     0   :  { %17 = vsyncpa [#allocation3], 0  ;;  %s2224_s0 = inlined_call_operand.hbm [shape: f32[8,128], index: 0, kind: input, shape index: {}]   ;;  %s2225_s1 = inlined_call_operand.hbm [shape: bf16[128,256], index: 1, kind: input, shape index: {}]   ;;  %s2226_s2 = inlined_call_operand.hbm [shape: bf16[256,256], index: 2, kind: input, shape index: {}]   ;;  %s2227_s3 = inlined_call_operand.vmem [shape: f32[1,256], index: 3, kind: input, shape index: {}]   ;;  %s2228_s4 = inlined_call_operand.hbm [shape: bf16[256,256], index: 4, kind: input, shape index: {}]   ;;  %s2229_s5 = inlined_call_operand.vmem [shape: f32[1,256], index: 5, kind: input, shape index: {}]   ;;  %s2230_s6 = inlined_call_operand.hbm [shape: bf16[256,256], index: 6, kind: input, shape index: {}]   ;;  %s2231_s7 = inlined_call_operand.vmem [shape: f32[1,256], index: 7, kind: input, shape index: {}]   ;;  %s2232_s8 = inlined_call_operand.hbm [shape: bf16[256,256], index: 8, kind: input, shape index: {}]   ;;  %s2233_s9 = inlined_call_operand.vmem [shape: f32[1,256], index: 9, kind: input, shape index: {}]   ;;  %s2234_s10 = inlined_call_operand.hbm [shape: bf16[256,128], index: 10, kind: input, shape index: {}]   ;;  %s2235_s11 = inlined_call_operand.vmem [shape: f32[1,128], index: 11, kind: input, shape index: {}]   ;;  %s2236_s12 = inlined_call_operand.hbm [shape: f32[8,128], index: 12, kind: output, shape index: {}]  }
   0x1   :  { %18 = vsyncpa [#allocation6], 0 }
   0x2   :  { %19 = vsyncpa [#allocation9], 0 }
   0x3   :  { %20 = vsyncpa [#allocation12], 0 }
   0x4   :  { %21 = vsyncpa [#allocation4], 0  ;;  %s2071_s21 = smov [#allocation5]  }
   0x5   :  { %s37_s22 = sshll.u32 %s2071_s21, 4  ;;  %s38_s22 = int_to_ptr.vmem [resolvable:$true] %s37_s22 }
   0x6   :  { %s1909_s23 = scalar_lea.vmem %s38_s22, 2048  ;;  %p1914_p1 = scmp.lt.s32.totalorder %s38_s22, %s38_s22 }
   0x7   :  { %p1910_p0 = scmp.ne.s32.totalorder %s38_s22, %s1909_s23  ;;  %p1915_p2 = scmp.lt.s32.totalorder %s1909_s23, %s1909_s23 }
   0x9   :  { %p1916_p3 = por %p1915_p2, %p1914_p1 }
   0xb   :  { %p1917_p4 = pnand %p1916_p3, %p1910_p0 }
   0xd   :  { %1920 = shalt.err (!%p1917_p4)
}
   0xe   :  { %s2072_s24 = smov 128   ;;  %s2073_s25 = smov 8  }
   0xf   :  { %43 = dma.hbm_to_vmem [thread:$0]  %s2225_s1, 2048, %s38_s22, [#allocation6], %s2072_s24, %s2072_s24, %s2073_s25  }
  0x10   :  { %s2074_s28 = smov [#allocation8]   ;;  %s2075_s30 = smov [#allocation11]  }
  0x11   :  { %s63_s29 = sshll.u32 %s2074_s28, 4  ;;  %s91_s13 = sshll.u32 %s2075_s30, 4  ;;  %s64_s29 = int_to_ptr.vmem [resolvable:$true] %s63_s29  ;;  %s92_s13 = int_to_ptr.vmem [resolvable:$true] %s91_s13 }
  0x12   :  { %s1929_s14 = scalar_lea.vmem %s64_s29, 4096  ;;  %p1934_p6 = scmp.lt.s32.totalorder %s64_s29, %s64_s29 }
  0x13   :  { %p1930_p5 = scmp.ne.s32.totalorder %s64_s29, %s1929_s14  ;;  %p1935_p7 = scmp.lt.s32.totalorder %s1929_s14, %s1929_s14 }
  0x15   :  { %p1936_p8 = por %p1935_p7, %p1934_p6 }
  0x17   :  { %p1937_p9 = pnand %p1936_p8, %p1930_p5 }
  0x19   :  { %1940 = shalt.err (!%p1937_p9)
}
  0x1a   :  { %69 = dma.hbm_to_vmem [thread:$0]  %s2228_s4, 4096, %s64_s29, [#allocation9], %s2072_s24, %s2072_s24, %s2073_s25  }
  0x1b   :  { %s1949_s1 = scalar_lea.vmem %s92_s13, 4096  ;;  %p1954_p11 = scmp.lt.s32.totalorder %s92_s13, %s92_s13 }
  0x1c   :  { %p1950_p10 = scmp.ne.s32.totalorder %s92_s13, %s1949_s1  ;;  %p1955_p12 = scmp.lt.s32.totalorder %s1949_s1, %s1949_s1 }
  0x1e   :  { %p1956_p13 = por %p1955_p12, %p1954_p11 }
  0x20   :  { %p1957_p0 = pnand %p1956_p13, %p1950_p10 }
  0x22   :  { %1960 = shalt.err (!%p1957_p0)
}
  0x23   :  { %97 = dma.hbm_to_vmem [thread:$0]  %s2232_s8, 4096, %s92_s13, [#allocation12], %s2072_s24, %s2072_s24, %s2073_s25  }
  0x24   :  { %s2076_s19 = smov [#allocation2]   ;;  %s2077_s21 = smov [#allocation7]  }
  0x25   :  { %s28_s20 = sshll.u32 %s2076_s19, 4  ;;  %s49_s4 = sshll.u32 %s2077_s21, 4  ;;  %s29_s20 = int_to_ptr.vmem [resolvable:$true] %s28_s20  ;;  %s50_s4 = int_to_ptr.vmem [resolvable:$true] %s49_s4 }
  0x26   :  { %s1969_s22 = scalar_lea.vmem %s29_s20, 128  ;;  %p1974_p2 = scmp.lt.s32.totalorder %s29_s20, %s29_s20 }
  0x27   :  { %p1970_p1 = scmp.ne.s32.totalorder %s29_s20, %s1969_s22  ;;  %p1975_p3 = scmp.lt.s32.totalorder %s1969_s22, %s1969_s22 }
  0x29   :  { %p1976_p4 = por %p1975_p3, %p1974_p2 }
  0x2b   :  { %p1977_p5 = pnand %p1976_p4, %p1970_p1 }
  0x2d   :  { %1980 = shalt.err (!%p1977_p5)
}
  0x2e   :  { %31 = dma.hbm_to_vmem [thread:$0]  %s2224_s0, 128, %s29_s20, [#allocation3]  }
  0x2f   :  { %s1989_s27 = scalar_lea.vmem %s50_s4, 4096  ;;  %p1994_p7 = scmp.lt.s32.totalorder %s50_s4, %s50_s4 }
  0x30   :  { %p1990_p6 = scmp.ne.s32.totalorder %s50_s4, %s1989_s27  ;;  %p1995_p8 = scmp.lt.s32.totalorder %s1989_s27, %s1989_s27 }
  0x32   :  { %p1996_p9 = por %p1995_p8, %p1994_p7 }
  0x34   :  { %p1997_p10 = pnand %p1996_p9, %p1990_p6 }
  0x36   :  { %2000 = shalt.err (!%p1997_p10)
}
  0x37   :  { %55 = dma.hbm_to_vmem [thread:$0]  %s2226_s2, 4096, %s50_s4, [#allocation6], %s2072_s24, %s2072_s24, %s2073_s25  }
  0x38   :  { %s2078_s29 = smov [#allocation10]   ;;  %s2079_s13 = smov [#allocation13]  }
  0x39   :  { %s77_s30 = sshll.u32 %s2078_s29, 4  ;;  %s105_s0 = sshll.u32 %s2079_s13, 4  ;;  %s78_s30 = int_to_ptr.vmem [resolvable:$true] %s77_s30  ;;  %s106_s0 = int_to_ptr.vmem [resolvable:$true] %s105_s0 }
  0x3a   :  { %s2009_s14 = scalar_lea.vmem %s78_s30, 4096  ;;  %p2014_p12 = scmp.lt.s32.totalorder %s78_s30, %s78_s30 }
  0x3b   :  { %p2010_p11 = scmp.ne.s32.totalorder %s78_s30, %s2009_s14  ;;  %p2015_p13 = scmp.lt.s32.totalorder %s2009_s14, %s2009_s14 }
  0x3d   :  { %p2016_p0 = por %p2015_p13, %p2014_p12 }
  0x3f   :  { %p2017_p1 = pnand %p2016_p0, %p2010_p11 }
  0x41   :  { %2020 = shalt.err (!%p2017_p1)
}
  0x42   :  { %83 = dma.hbm_to_vmem [thread:$0]  %s2230_s6, 4096, %s78_s30, [#allocation9], %s2072_s24, %s2072_s24, %s2073_s25  }
  0x43   :  { %s2029_s2 = scalar_lea.vmem %s106_s0, 2048  ;;  %p2034_p3 = scmp.lt.s32.totalorder %s106_s0, %s106_s0 }
  0x44   :  { %p2030_p2 = scmp.ne.s32.totalorder %s106_s0, %s2029_s2  ;;  %p2035_p4 = scmp.lt.s32.totalorder %s2029_s2, %s2029_s2 }
  0x46   :  { %p2036_p5 = por %p2035_p4, %p2034_p3 }
  0x48   :  { %p2037_p6 = pnand %p2036_p5, %p2030_p2 }
  0x4a   :  { %2040 = shalt.err (!%p2037_p6)
}
  0x4b   :  { %s2080_s1 = smov 64   ;;  %s2081_s17 = smov 4  }
  0x4c   :  { %111 = dma.hbm_to_vmem [thread:$0]  %s2234_s10, 2048, %s106_s0, [#allocation12], %s2080_s1, %s2080_s1, %s2081_s17  }
  0x4d   :  { %2061 = dma.done.wait [#allocation3], 128  }
  0x4e   :  { %2062 = vsyncadd [#allocation3], 4294967168 }
  0x4f   :  { %2063 = dma.done.wait [#allocation6], 6144  }
  0x50   :  { %2064 = vsyncadd [#allocation6], 4294961152 }
  0x51   :  { %2065 = dma.done.wait [#allocation9], 8192  }
  0x52   :  { %2066 = vsyncadd [#allocation9], 4294959104 }
  0x53   :  { %2067 = dma.done.wait [#allocation12], 6144  }
  0x54   :  { %2068 = vsyncadd [#allocation12], 4294961152  ;;  %v2082_v0 = vmov 0   ;;  %v1665_v1 = vld [vmem:[#allocation5 + $0x74] ss:$8 sps:$4 sm:$0xff]   ;;  %s2083_s4 = smov [#allocation14]  }
  0x55   :  { %266 = vmatprep.mubr.bf16.mxu0 %v2082_v0  ;;  %v1667_v2 = vld [vmem:[#allocation5 + $0x70] ss:$8 sps:$4 sm:$0xff]   ;;  %234 = vmatprep.subr.bf16.mxu0 %v1665_v1  ;;  %v1668_v3 = vld [vmem:[#allocation5 + $0x64] ss:$8 sps:$4 sm:$0xff]   ;;  %v1670_v4 = vld [vmem:[#allocation5 + $0x60] ss:$8 sps:$4 sm:$0xff]  }
  0x56   :  { %235 = vmatpush1.bf16.msra.mxu0 %v1667_v2  ;;  %v1671_v5 = vld [vmem:[#allocation5 + $0x54] ss:$8 sps:$4 sm:$0xff]   ;;  %v1673_v6 = vld [vmem:[#allocation5 + $0x50] ss:$8 sps:$4 sm:$0xff]   ;;  %v1674_v7 = vld [vmem:[#allocation5 + $0x44] ss:$8 sps:$4 sm:$0xff]  }
  0x57   :  { %236 = vmatprep.subr.bf16.mxu0 %v1668_v3  ;;  %v1676_v8 = vld [vmem:[#allocation5 + $0x40] ss:$8 sps:$4 sm:$0xff]   ;;  %v1677_v9 = vld [vmem:[#allocation5 + $0x34] ss:$8 sps:$4 sm:$0xff]   ;;  %v1691_v11 = vld [vmem:[#allocation7 + $0x70] ss:$8 sps:$4 sm:$0xff]  }
  0x58   :  { %v1689_v10 = vld [vmem:[#allocation7 + $0x74] ss:$8 sps:$4 sm:$0xff]   ;;  %v1692_v12 = vld [vmem:[#allocation7 + $0x64] ss:$8 sps:$4 sm:$0xff]   ;;  %v1679_v13 = vld [vmem:[#allocation5 + $0x30] ss:$8 sps:$4 sm:$0xff]  }
  0x59   :  { %483 = vmatprep.subr.bf16.mxu1 %v1689_v10  ;;  %v1694_v14 = vld [vmem:[#allocation7 + $0x60] ss:$8 sps:$4 sm:$0xff]   ;;  %v1695_v15 = vld [vmem:[#allocation7 + $0x54] ss:$8 sps:$4 sm:$0xff]   ;;  %v1680_v16 = vld [vmem:[#allocation5 + $0x24] ss:$8 sps:$4 sm:$0xff]  }
  0x5a   :  { %237 = vmatpush1.bf16.msra.mxu0 %v1670_v4  ;;  %484 = vmatpush1.bf16.msra.mxu1 %v1691_v11  ;;  %v1682_v17 = vld [vmem:[#allocation5 + $0x20] ss:$8 sps:$4 sm:$0xff]   ;;  %v1697_v18 = vld [vmem:[#allocation7 + $0x50] ss:$8 sps:$4 sm:$0xff]   ;;  %v1698_v19 = vld [vmem:[#allocation7 + $0x44] ss:$8 sps:$4 sm:$0xff]  }
  0x5b   :  { %238 = vmatprep.subr.bf16.mxu0 %v1671_v5  ;;  %485 = vmatprep.subr.bf16.mxu1 %v1692_v12  ;;  %v1683_v20 = vld [vmem:[#allocation5 + $0x14] ss:$8 sps:$4 sm:$0xff]   ;;  %v1685_v21 = vld [vmem:[#allocation5 + $0x10] ss:$8 sps:$4 sm:$0xff]   ;;  %v1700_v22 = vld [vmem:[#allocation7 + $0x40] ss:$8 sps:$4 sm:$0xff]  }
  0x5c   :  { %v1701_v23 = vld [vmem:[#allocation7 + $0x34] ss:$8 sps:$4 sm:$0xff]   ;;  %v1686_v24 = vld [vmem:[#allocation5 + $0x4] ss:$8 sps:$4 sm:$0xff]   ;;  %v1688_v25 = vld [vmem:[#allocation5] ss:$8 sps:$4 sm:$0xff]  }
  0x5d   :  { %v136_v26 = vld [vmem:[#allocation2] sm:$0xff]  ;;  %v1704_v28 = vld [vmem:[#allocation7 + $0x24] ss:$8 sps:$4 sm:$0xff]   ;;  %v1706_v29 = vld [vmem:[#allocation7 + $0x20] ss:$8 sps:$4 sm:$0xff]   ;;  %s1457_s22 = sshll.u32 %s2083_s4, 4  ;;  %s1458_s22 = int_to_ptr.vmem [resolvable:$true] %s1457_s22 }
  0x5e   :  { %239 = vmatpush1.bf16.msra.mxu0 %v1673_v6  ;;  %486 = vmatpush1.bf16.msra.mxu1 %v1694_v14  ;;  %v1703_v27 = vld [vmem:[#allocation7 + $0x30] ss:$8 sps:$4 sm:$0xff]   ;;  %v1707_v30 = vld [vmem:[#allocation7 + $0x14] ss:$8 sps:$4 sm:$0xff]   ;;  %v137_v31 = vpack.c.bf16 %v136_v26, %v136_v26  ;;  %v1710_v33 = vld [vmem:[#allocation7 + $0x4] ss:$8 sps:$4 sm:$0xff]   ;;  %p2046_p8 = scmp.lt.s32.totalorder %s1458_s22, %s1458_s22 }
  0x5f   :  { %240 = vmatprep.subr.bf16.mxu0 %v1674_v7  ;;  %487 = vmatprep.subr.bf16.mxu1 %v1695_v15  ;;  %v1709_v32 = vld [vmem:[#allocation7 + $0x10] ss:$8 sps:$4 sm:$0xff]   ;;  %v1712_v34 = vld [vmem:[#allocation7] ss:$8 sps:$4 sm:$0xff]   ;;  %v1713_v35 = vld [vmem:[#allocation7 + $0xf4] ss:$8 sps:$4 sm:$0xff]  }
  0x60   :  { %v1715_v36 = vld [vmem:[#allocation7 + $0xf0] ss:$8 sps:$4 sm:$0xff]   ;;  %v1716_v37 = vld [vmem:[#allocation7 + $0xe4] ss:$8 sps:$4 sm:$0xff]   ;;  %v1718_v38 = vld [vmem:[#allocation7 + $0xe0] ss:$8 sps:$4 sm:$0xff]  }
  0x61   :  { %v1719_v39 = vld [vmem:[#allocation7 + $0xd4] ss:$8 sps:$4 sm:$0xff]   ;;  %v1721_v40 = vld [vmem:[#allocation7 + $0xd0] ss:$8 sps:$4 sm:$0xff]   ;;  %v1722_v41 = vld [vmem:[#allocation7 + $0xc4] ss:$8 sps:$4 sm:$0xff]  }
  0x62   :  { %241 = vmatpush1.bf16.msra.mxu0 %v1676_v8  ;;  %488 = vmatpush1.bf16.msra.mxu1 %v1697_v18  ;;  %v1724_v42 = vld [vmem:[#allocation7 + $0xc0] ss:$8 sps:$4 sm:$0xff]   ;;  %v1725_v43 = vld [vmem:[#allocation7 + $0xb4] ss:$8 sps:$4 sm:$0xff]   ;;  %v1727_v44 = vld [vmem:[#allocation7 + $0xb0] ss:$8 sps:$4 sm:$0xff]  }
  0x63   :  { %242 = vmatprep.subr.bf16.mxu0 %v1677_v9  ;;  %489 = vmatprep.subr.bf16.mxu1 %v1698_v19  ;;  %v1728_v45 = vld [vmem:[#allocation7 + $0xa4] ss:$8 sps:$4 sm:$0xff]   ;;  %v1730_v46 = vld [vmem:[#allocation7 + $0xa0] ss:$8 sps:$4 sm:$0xff]   ;;  %v1731_v47 = vld [vmem:[#allocation7 + $0x94] ss:$8 sps:$4 sm:$0xff]  }
  0x64   :  { %v1733_v48 = vld [vmem:[#allocation7 + $0x90] ss:$8 sps:$4 sm:$0xff]   ;;  %v1734_v49 = vld [vmem:[#allocation7 + $0x84] ss:$8 sps:$4 sm:$0xff]   ;;  %v1736_v50 = vld [vmem:[#allocation7 + $0x80] ss:$8 sps:$4 sm:$0xff]  }
  0x65   :  { %v1737_v51 = vld [vmem:[#allocation8 + $0x70] ss:$8 sps:$4 sm:$0xff]   ;;  %v1739_v52 = vld [vmem:[#allocation8 + $0x74] ss:$8 sps:$4 sm:$0xff]   ;;  %v1742_v53 = vld [vmem:[#allocation8 + $0x64] ss:$8 sps:$4 sm:$0xff]  }
  0x66   :  { %243 = vmatpush1.bf16.msra.mxu0 %v1679_v13  ;;  %490 = vmatpush1.bf16.msra.mxu1 %v1700_v22  ;;  %v1740_v54 = vld [vmem:[#allocation8 + $0x60] ss:$8 sps:$4 sm:$0xff]   ;;  %v1745_v55 = vld [vmem:[#allocation8 + $0x54] ss:$8 sps:$4 sm:$0xff]   ;;  %v1743_v56 = vld [vmem:[#allocation8 + $0x50] ss:$8 sps:$4 sm:$0xff]  }
  0x67   :  { %244 = vmatprep.subr.bf16.mxu0 %v1680_v16  ;;  %491 = vmatprep.subr.bf16.mxu1 %v1701_v23  ;;  %v1748_v57 = vld [vmem:[#allocation8 + $0x44] ss:$8 sps:$4 sm:$0xff]   ;;  %v1746_v58 = vld [vmem:[#allocation8 + $0x40] ss:$8 sps:$4 sm:$0xff]   ;;  %v1751_v59 = vld [vmem:[#allocation8 + $0x34] ss:$8 sps:$4 sm:$0xff]  }
  0x68   :  { %v1749_v60 = vld [vmem:[#allocation8 + $0x30] ss:$8 sps:$4 sm:$0xff]   ;;  %v1754_v61 = vld [vmem:[#allocation8 + $0x24] ss:$8 sps:$4 sm:$0xff]   ;;  %v1752_v62 = vld [vmem:[#allocation8 + $0x20] ss:$8 sps:$4 sm:$0xff]  }
  0x69   :  { %v1757_v63 = vld [vmem:[#allocation8 + $0x14] ss:$8 sps:$4 sm:$0xff]   ;;  %v1755_v1 = vld [vmem:[#allocation8 + $0x10] ss:$8 sps:$4 sm:$0xff]   ;;  %v1760_v2 = vld [vmem:[#allocation8 + $0x4] ss:$8 sps:$4 sm:$0xff]  }
  0x6a   :  { %245 = vmatpush1.bf16.msra.mxu0 %v1682_v17  ;;  %492 = vmatpush1.bf16.msra.mxu1 %v1703_v27  ;;  %v1758_v3 = vld [vmem:[#allocation8] ss:$8 sps:$4 sm:$0xff]   ;;  %v1763_v4 = vld [vmem:[#allocation8 + $0xf4] ss:$8 sps:$4 sm:$0xff]   ;;  %v1761_v5 = vld [vmem:[#allocation8 + $0xf0] ss:$8 sps:$4 sm:$0xff]  }
  0x6b   :  { %246 = vmatprep.subr.bf16.mxu0 %v1683_v20  ;;  %493 = vmatprep.subr.bf16.mxu1 %v1704_v28  ;;  %v1766_v6 = vld [vmem:[#allocation8 + $0xe4] ss:$8 sps:$4 sm:$0xff]   ;;  %v1764_v7 = vld [vmem:[#allocation8 + $0xe0] ss:$8 sps:$4 sm:$0xff]   ;;  %v1769_v8 = vld [vmem:[#allocation8 + $0xd4] ss:$8 sps:$4 sm:$0xff]  }
  0x6c   :  { %v1767_v9 = vld [vmem:[#allocation8 + $0xd0] ss:$8 sps:$4 sm:$0xff]   ;;  %v1772_v10 = vld [vmem:[#allocation8 + $0xc4] ss:$8 sps:$4 sm:$0xff]   ;;  %v1770_v11 = vld [vmem:[#allocation8 + $0xc0] ss:$8 sps:$4 sm:$0xff]  }
  0x6d   :  { %v1775_v12 = vld [vmem:[#allocation8 + $0xb4] ss:$8 sps:$4 sm:$0xff]   ;;  %v1773_v13 = vld [vmem:[#allocation8 + $0xb0] ss:$8 sps:$4 sm:$0xff]   ;;  %v1778_v14 = vld [vmem:[#allocation8 + $0xa4] ss:$8 sps:$4 sm:$0xff]  }
  0x6e   :  { %247 = vmatpush1.bf16.msra.mxu0 %v1685_v21  ;;  %494 = vmatpush1.bf16.msra.mxu1 %v1706_v29  ;;  %v1776_v15 = vld [vmem:[#allocation8 + $0xa0] ss:$8 sps:$4 sm:$0xff]   ;;  %v1784_v26 = vld [vmem:[#allocation8 + $0x84] ss:$8 sps:$4 sm:$0xff]   ;;  %v1785_v28 = vld [vmem:[#allocation10 + $0x70] ss:$8 sps:$4 sm:$0xff]  }
  0x6f   :  { %248 = vmatprep.subr.bf16.mxu0 %v1686_v24  ;;  %495 = vmatprep.subr.bf16.mxu1 %v1707_v30  ;;  %v1781_v24 = vld [vmem:[#allocation8 + $0x94] ss:$8 sps:$4 sm:$0xff]   ;;  %v1782_v27 = vld [vmem:[#allocation8 + $0x80] ss:$8 sps:$4 sm:$0xff]   ;;  %v1790_v30 = vld [vmem:[#allocation10 + $0x64] ss:$8 sps:$4 sm:$0xff]  }
  0x70   :  { %v1787_v29 = vld [vmem:[#allocation10 + $0x74] ss:$8 sps:$4 sm:$0xff]   ;;  %s2041_s23 = scalar_lea.vmem %s1458_s22, 128 }
  0x71   :  { %p2042_p7 = scmp.ne.s32.totalorder %s1458_s22, %s2041_s23  ;;  %p2047_p9 = scmp.lt.s32.totalorder %s2041_s23, %s2041_s23 }
  0x72   :  { %249 = vmatpush1.bf16.msra.mxu0 %v1688_v25  ;;  %496 = vmatpush1.bf16.msra.mxu1 %v1709_v32  ;;  %v1779_v25 = vld [vmem:[#allocation8 + $0x90] ss:$8 sps:$4 sm:$0xff]   ;;  %v1793_v32 = vld [vmem:[#allocation10 + $0x54] ss:$8 sps:$4 sm:$0xff]  }
  0x73   :  { %497 = vmatprep.subr.bf16.mxu1 %v1710_v33  ;;  %732 = vmatprep.subr.bf16.mxu0 %v1739_v52  ;;  %v1791_v33 = vld [vmem:[#allocation10 + $0x50] ss:$8 sps:$4 sm:$0xff]   ;;  %v1823_v52 = vld [vmem:[#allocation10 + $0xb4] ss:$8 sps:$4 sm:$0xff]   ;;  %p2048_p10 = por %p2047_p9, %p2046_p8 }
  0x75   :  { %267 = vmatmul.mubr.bf16.vlgmr.msra.gmra.mxu0 %v137_v31  ;;  %v1788_v31 = vld [vmem:[#allocation10 + $0x60] ss:$8 sps:$4 sm:$0xff]   ;;  %p2049_p11 = pnand %p2048_p10, %p2042_p7 }
  0x76   :  { %498 = vmatpush1.bf16.msra.mxu1 %v1712_v34  ;;  %733 = vmatpush1.bf16.msra.mxu0 %v1737_v51  ;;  %v1796_v34 = vld [vmem:[#allocation10 + $0x44] ss:$8 sps:$4 sm:$0xff]   ;;  %v1818_v51 = vld [vmem:[#allocation10 + $0xc0] ss:$8 sps:$4 sm:$0xff]  }
  0x77   :  { %499 = vmatprep.subr.bf16.mxu1 %v1713_v35  ;;  %734 = vmatprep.subr.bf16.mxu0 %v1742_v53  ;;  %v1794_v35 = vld [vmem:[#allocation10 + $0x40] ss:$8 sps:$4 sm:$0xff]   ;;  %v1821_v53 = vld [vmem:[#allocation10 + $0xb0] ss:$8 sps:$4 sm:$0xff]  }
  0x7a   :  { %500 = vmatpush2.bf16.msra.mxu1 %v1715_v36  ;;  %735 = vmatpush1.bf16.msra.mxu0 %v1740_v54  ;;  %v1799_v36 = vld [vmem:[#allocation10 + $0x34] ss:$8 sps:$4 sm:$0xff]   ;;  %v1826_v54 = vld [vmem:[#allocation10 + $0xa4] ss:$8 sps:$4 sm:$0xff]  }
  0x7b   :  { %501 = vmatprep.subr.bf16.mxu1 %v1716_v37  ;;  %736 = vmatprep.subr.bf16.mxu0 %v1745_v55  ;;  %v1797_v37 = vld [vmem:[#allocation10 + $0x30] ss:$8 sps:$4 sm:$0xff]   ;;  %v1824_v55 = vld [vmem:[#allocation10 + $0xa0] ss:$8 sps:$4 sm:$0xff]  }
  0x7e   :  { %502 = vmatpush2.bf16.msra.mxu1 %v1718_v38  ;;  %737 = vmatpush1.bf16.msra.mxu0 %v1743_v56  ;;  %v1802_v38 = vld [vmem:[#allocation10 + $0x24] ss:$8 sps:$4 sm:$0xff]   ;;  %v313_v56 = vlaneseq }
  0x7f   :  { %503 = vmatprep.subr.bf16.mxu1 %v1719_v39  ;;  %738 = vmatprep.subr.bf16.mxu0 %v1748_v57  ;;  %v1800_v39 = vld [vmem:[#allocation10 + $0x20] ss:$8 sps:$4 sm:$0xff]  }
  0x80   :  { %v314_v57 = vshrl.u32 %v313_v56, 7  ;;  %v1875_v56 = vld [vmem:[#allocation11 + $0x90] ss:$8 sps:$4 sm:$0xff]  }
  0x82   :  { %504 = vmatpush2.bf16.msra.mxu1 %v1721_v40  ;;  %739 = vmatpush1.bf16.msra.mxu0 %v1746_v58  ;;  %v1805_v40 = vld [vmem:[#allocation10 + $0x14] ss:$8 sps:$4 sm:$0xff]   ;;  %v2186_v58 = vsub.s32 0, %v314_v57 }
  0x83   :  { %505 = vmatprep.subr.bf16.mxu1 %v1722_v41  ;;  %740 = vmatprep.subr.bf16.mxu0 %v1751_v59  ;;  %v1803_v41 = vld [vmem:[#allocation10 + $0x10] ss:$8 sps:$4 sm:$0xff]  }
  0x84   :  { %v311_v59 = vld [vmem:[%s2227_s3] sm:$0x3] }
  0x86   :  { %506 = vmatpush2.bf16.msra.mxu1 %v1724_v42  ;;  %741 = vmatpush1.bf16.msra.mxu0 %v1749_v60  ;;  %v1808_v42 = vld [vmem:[#allocation10 + $0x4] ss:$8 sps:$4 sm:$0xff]   ;;  %v2191_v60 = vsub.s32 1, %v314_v57 }
  0x87   :  { %507 = vmatprep.subr.bf16.mxu1 %v1725_v43  ;;  %742 = vmatprep.subr.bf16.mxu0 %v1754_v61  ;;  %v1806_v43 = vld [vmem:[#allocation10] ss:$8 sps:$4 sm:$0xff]   ;;  %v316_v61 = vrot.slane %v311_v59, %v2186_v58  ;;  %v1880_v57 = vld [vmem:[#allocation11 + $0x84] ss:$8 sps:$4 sm:$0xff]  }
  0x8a   :  { %508 = vmatpush2.bf16.msra.mxu1 %v1727_v44  ;;  %743 = vmatpush1.bf16.msra.mxu0 %v1752_v62  ;;  %v1811_v44 = vld [vmem:[#allocation10 + $0xf4] ss:$8 sps:$4 sm:$0xff]   ;;  %v320_v62 = vrot.slane %v311_v59, %v2191_v60  ;;  %v1878_v59 = vld [vmem:[#allocation11 + $0x80] ss:$8 sps:$4 sm:$0xff]  }
  0x8b   :  { %509 = vmatprep.subr.bf16.mxu1 %v1728_v45  ;;  %744 = vmatprep.subr.bf16.mxu0 %v1757_v63  ;;  %v1809_v45 = vld [vmem:[#allocation10 + $0xf0] ss:$8 sps:$4 sm:$0xff]  }
  0x8e   :  { %510 = vmatpush2.bf16.msra.mxu1 %v1730_v46  ;;  %745 = vmatpush1.bf16.msra.mxu0 %v1755_v1  ;;  %v1814_v46 = vld [vmem:[#allocation10 + $0xe4] ss:$8 sps:$4 sm:$0xff]  }
  0x8f   :  { %511 = vmatprep.subr.bf16.mxu1 %v1731_v47  ;;  %746 = vmatprep.subr.bf16.mxu0 %v1760_v2  ;;  %v1812_v47 = vld [vmem:[#allocation10 + $0xe0] ss:$8 sps:$4 sm:$0xff]  }
  0x92   :  { %512 = vmatpush2.bf16.msra.mxu1 %v1733_v48  ;;  %747 = vmatpush1.bf16.msra.mxu0 %v1758_v3  ;;  %v1817_v48 = vld [vmem:[#allocation10 + $0xd4] ss:$8 sps:$4 sm:$0xff]  }
  0x93   :  { %513 = vmatprep.subr.bf16.mxu1 %v1734_v49  ;;  %748 = vmatprep.subr.bf16.mxu0 %v1763_v4  ;;  %v1815_v49 = vld [vmem:[#allocation10 + $0xd0] ss:$8 sps:$4 sm:$0xff]  }
  0x96   :  { %514 = vmatpush2.bf16.msra.mxu1 %v1736_v50  ;;  %749 = vmatpush2.bf16.msra.mxu0 %v1761_v5  ;;  %v1820_v50 = vld [vmem:[#allocation10 + $0xc4] ss:$8 sps:$4 sm:$0xff]  }
  0x97   :  { %750 = vmatprep.subr.bf16.mxu0 %v1766_v6  ;;  %981 = vmatprep.subr.bf16.mxu1 %v1787_v29  ;;  %v1854_v29 = vld [vmem:[#allocation11] ss:$8 sps:$4 sm:$0xff]  }
  0x9a   :  { %751 = vmatpush2.bf16.msra.mxu0 %v1764_v7 }
  0x9b   :  { %752 = vmatprep.subr.bf16.mxu0 %v1769_v8 }
  0x9e   :  { %753 = vmatpush2.bf16.msra.mxu0 %v1767_v9 }
  0x9f   :  { %754 = vmatprep.subr.bf16.mxu0 %v1772_v10  ;;  %v1829_v10 = vld [vmem:[#allocation10 + $0x94] ss:$8 sps:$4 sm:$0xff]  }
  0xa2   :  { %755 = vmatpush2.bf16.msra.mxu0 %v1770_v11  ;;  %v1827_v11 = vld [vmem:[#allocation10 + $0x90] ss:$8 sps:$4 sm:$0xff]  }
  0xa3   :  { %756 = vmatprep.subr.bf16.mxu0 %v1775_v12  ;;  %v1832_v12 = vld [vmem:[#allocation10 + $0x84] ss:$8 sps:$4 sm:$0xff]  }
  0xa6   :  { %757 = vmatpush2.bf16.msra.mxu0 %v1773_v13  ;;  %v1830_v13 = vld [vmem:[#allocation10 + $0x80] ss:$8 sps:$4 sm:$0xff]  }
  0xa7   :  { %758 = vmatprep.subr.bf16.mxu0 %v1778_v14  ;;  %v1833_v14 = vld [vmem:[#allocation11 + $0x70] ss:$8 sps:$4 sm:$0xff]  }
  0xaa   :  { %759 = vmatpush2.bf16.msra.mxu0 %v1776_v15  ;;  %v1835_v15 = vld [vmem:[#allocation11 + $0x74] ss:$8 sps:$4 sm:$0xff]  }
  0xab   :  { %760 = vmatprep.subr.bf16.mxu0 %v1781_v24  ;;  %v1850_v24 = vld [vmem:[#allocation11 + $0x24] ss:$8 sps:$4 sm:$0xff]  }
  0xae   :  { %761 = vmatpush2.bf16.msra.mxu0 %v1779_v25  ;;  %v1848_v25 = vld [vmem:[#allocation11 + $0x20] ss:$8 sps:$4 sm:$0xff]  }
  0xaf   :  { %762 = vmatprep.subr.bf16.mxu0 %v1784_v26  ;;  %v1853_v26 = vld [vmem:[#allocation11 + $0x14] ss:$8 sps:$4 sm:$0xff]  }
  0xb2   :  { %763 = vmatpush2.bf16.msra.mxu0 %v1782_v27  ;;  %v1851_v27 = vld [vmem:[#allocation11 + $0x10] ss:$8 sps:$4 sm:$0xff]  }
  0xb3   :  { %1230 = vmatprep.subr.bf16.mxu0 %v1835_v15 }
 0x135   :  { %v268_v16 = vpop.f32.mrf.mxu0 }
 0x136   :  { %1897 = vtanh.f32 %v268_v16  ;;  %v1838_v16 = vld [vmem:[#allocation11 + $0x64] ss:$8 sps:$4 sm:$0xff]  }
 0x137   :  { %v270_v17 = vpop.f32.mrf.mxu0 }
 0x138   :  { %1899 = vtanh.f32 %v270_v17  ;;  %v1836_v17 = vld [vmem:[#allocation11 + $0x60] ss:$8 sps:$4 sm:$0xff]  }
 0x139   :  { %v272_v18 = vpop.f32.mrf.mxu0 }
 0x13a   :  { %v1841_v18 = vld [vmem:[#allocation11 + $0x54] ss:$8 sps:$4 sm:$0xff]  }
 0x13b   :  { %v273_v19 = vpop.f32.mrf.mxu0 }
 0x13c   :  { %v1839_v19 = vld [vmem:[#allocation11 + $0x50] ss:$8 sps:$4 sm:$0xff]  }
 0x143   :  { %v1898_v20 = vpop.eup %1897 }
 0x144   :  { %v277_v23 = vpack.c.bf16 %v1898_v20, %v1898_v20  ;;  %v1844_v20 = vld [vmem:[#allocation11 + $0x44] ss:$8 sps:$4 sm:$0xff]  }
 0x145   :  { %v1900_v21 = vpop.eup %1899 }
 0x146   :  { %v278_v22 = vpack.c.bf16 %v1900_v21, %v1900_v21  ;;  %v1842_v21 = vld [vmem:[#allocation11 + $0x40] ss:$8 sps:$4 sm:$0xff]  }
 0x148   :  { %515 = vmatprep.mubr.bf16.mxu1 %v278_v22  ;;  %v1847_v22 = vld [vmem:[#allocation11 + $0x34] ss:$8 sps:$4 sm:$0xff]  }
 0x149   :  { %516 = vmatmul.mubr.bf16.vlgmr.msra.gmra.mxu1 %v277_v23  ;;  %v1845_v23 = vld [vmem:[#allocation11 + $0x30] ss:$8 sps:$4 sm:$0xff]  }
 0x14a   :  { %982 = vmatpush1.bf16.msra.mxu1 %v1785_v28  ;;  %v1856_v28 = vld [vmem:[#allocation11 + $0x4] ss:$8 sps:$4 sm:$0xff]  }
 0x14b   :  { %983 = vmatprep.subr.bf16.mxu1 %v1790_v30  ;;  %v1859_v30 = vld [vmem:[#allocation11 + $0xf4] ss:$8 sps:$4 sm:$0xff]  }
 0x14e   :  { %984 = vmatpush1.bf16.msra.mxu1 %v1788_v31  ;;  %v1857_v31 = vld [vmem:[#allocation11 + $0xf0] ss:$8 sps:$4 sm:$0xff]  }
 0x14f   :  { %985 = vmatprep.subr.bf16.mxu1 %v1793_v32  ;;  %v1862_v32 = vld [vmem:[#allocation11 + $0xe4] ss:$8 sps:$4 sm:$0xff]  }
 0x152   :  { %986 = vmatpush1.bf16.msra.mxu1 %v1791_v33  ;;  %v1860_v33 = vld [vmem:[#allocation11 + $0xe0] ss:$8 sps:$4 sm:$0xff]  }
 0x153   :  { %987 = vmatprep.subr.bf16.mxu1 %v1796_v34  ;;  %v1865_v34 = vld [vmem:[#allocation11 + $0xd4] ss:$8 sps:$4 sm:$0xff]  }
 0x156   :  { %988 = vmatpush1.bf16.msra.mxu1 %v1794_v35  ;;  %v1863_v35 = vld [vmem:[#allocation11 + $0xd0] ss:$8 sps:$4 sm:$0xff]  }
 0x157   :  { %989 = vmatprep.subr.bf16.mxu1 %v1799_v36  ;;  %v1868_v36 = vld [vmem:[#allocation11 + $0xc4] ss:$8 sps:$4 sm:$0xff]  }
 0x15a   :  { %990 = vmatpush1.bf16.msra.mxu1 %v1797_v37  ;;  %v1866_v37 = vld [vmem:[#allocation11 + $0xc0] ss:$8 sps:$4 sm:$0xff]  }
 0x15b   :  { %991 = vmatprep.subr.bf16.mxu1 %v1802_v38  ;;  %v1871_v38 = vld [vmem:[#allocation11 + $0xb4] ss:$8 sps:$4 sm:$0xff]  }
 0x15e   :  { %992 = vmatpush1.bf16.msra.mxu1 %v1800_v39  ;;  %v1869_v39 = vld [vmem:[#allocation11 + $0xb0] ss:$8 sps:$4 sm:$0xff]  }
 0x15f   :  { %993 = vmatprep.subr.bf16.mxu1 %v1805_v40  ;;  %v1874_v40 = vld [vmem:[#allocation11 + $0xa4] ss:$8 sps:$4 sm:$0xff]  }
 0x162   :  { %994 = vmatpush1.bf16.msra.mxu1 %v1803_v41  ;;  %v1872_v41 = vld [vmem:[#allocation11 + $0xa0] ss:$8 sps:$4 sm:$0xff]  }
 0x163   :  { %995 = vmatprep.subr.bf16.mxu1 %v1808_v42  ;;  %v560_v42 = vld [vmem:[%s2229_s5] sm:$0x3] }
 0x166   :  { %996 = vmatpush1.bf16.msra.mxu1 %v1806_v43  ;;  %v565_v43 = vrot.slane %v560_v42, %v2186_v58 }
 0x167   :  { %997 = vmatprep.subr.bf16.mxu1 %v1811_v44  ;;  %v569_v44 = vrot.slane %v560_v42, %v2191_v60 }
 0x16a   :  { %998 = vmatpush2.bf16.msra.mxu1 %v1809_v45 }
 0x16b   :  { %999 = vmatprep.subr.bf16.mxu1 %v1814_v46 }
 0x16e   :  { %1000 = vmatpush2.bf16.msra.mxu1 %v1812_v47 }
 0x16f   :  { %1001 = vmatprep.subr.bf16.mxu1 %v1817_v48 }
 0x172   :  { %1002 = vmatpush2.bf16.msra.mxu1 %v1815_v49 }
 0x173   :  { %1003 = vmatprep.subr.bf16.mxu1 %v1820_v50 }
 0x176   :  { %1004 = vmatpush2.bf16.msra.mxu1 %v1818_v51 }
 0x177   :  { %1005 = vmatprep.subr.bf16.mxu1 %v1823_v52 }
 0x17a   :  { %1006 = vmatpush2.bf16.msra.mxu1 %v1821_v53 }
 0x17b   :  { %1007 = vmatprep.subr.bf16.mxu1 %v1826_v54 }
 0x17e   :  { %1008 = vmatpush2.bf16.msra.mxu1 %v1824_v55  ;;  %v1877_v55 = vld [vmem:[#allocation11 + $0x94] ss:$8 sps:$4 sm:$0xff]  }
 0x17f   :  { %1009 = vmatprep.subr.bf16.mxu1 %v1829_v10  ;;  %v809_v10 = vld [vmem:[%s2231_s7] sm:$0x3] }
 0x182   :  { %1010 = vmatpush2.bf16.msra.mxu1 %v1827_v11  ;;  %v814_v11 = vrot.slane %v809_v10, %v2186_v58 }
 0x183   :  { %1011 = vmatprep.subr.bf16.mxu1 %v1832_v12  ;;  %v818_v12 = vrot.slane %v809_v10, %v2191_v60 }
 0x186   :  { %1012 = vmatpush2.bf16.msra.mxu1 %v1830_v13 }
 0x209   :  { %v517_v63 = vpop.f32.mrf.mxu1 }
 0x20a   :  { %v518_v1 = vadd.f32 %v517_v63, %v316_v61  ;;  %v1881_v61 = vld [vmem:[#allocation13 + $0x78] sm:$0xff]   ;;  %v1883_v63 = vld [vmem:[#allocation13 + $0x70] sm:$0xff]  }
 0x20b   :  { %v519_v2 = vpop.f32.mrf.mxu1  ;;  %1630 = vmatprep.subr.bf16.mxu1 %v1881_v61 }
 0x20c   :  { %v520_v3 = vadd.f32 %v519_v2, %v320_v62  ;;  %v524_v4 = vpack.c.bf16 %v518_v1, %v518_v1  ;;  %v1882_v62 = vld [vmem:[#allocation13 + $0x38] sm:$0xff]   ;;  %v1884_v1 = vld [vmem:[#allocation13 + $0x30] sm:$0xff]   ;;  %v1885_v2 = vld [vmem:[#allocation13 + $0x68] sm:$0xff]  }
 0x20d   :  { %v521_v5 = vpop.f32.mrf.mxu1 }
 0x20e   :  { %v525_v6 = vpack.c.bf16 %v520_v3, %v520_v3  ;;  %v526_v9 = vmax.bf16 %v2082_v0, %v524_v4  ;;  %v1886_v3 = vld [vmem:[#allocation13 + $0x28] sm:$0xff]   ;;  %v1887_v4 = vld [vmem:[#allocation13 + $0x60] sm:$0xff]  }
 0x20f   :  { %v522_v7 = vpop.f32.mrf.mxu1  ;;  %v1888_v5 = vld [vmem:[#allocation13 + $0x20] sm:$0xff]  }
 0x210   :  { %v527_v8 = vmax.bf16 %v2082_v0, %v525_v6  ;;  %v1889_v6 = vld [vmem:[#allocation13 + $0x58] sm:$0xff]  }
 0x211   :  { %v1890_v7 = vld [vmem:[#allocation13 + $0x18] sm:$0xff]  }
 0x212   :  { %764 = vmatprep.mubr.bf16.mxu0 %v527_v8  ;;  %v1891_v8 = vld [vmem:[#allocation13 + $0x50] sm:$0xff]  }
 0x213   :  { %765 = vmatmul.mubr.bf16.vlgmr.msra.gmra.mxu0 %v526_v9  ;;  %v1892_v9 = vld [vmem:[#allocation13 + $0x10] sm:$0xff]  }
 0x214   :  { %1231 = vmatpush1.bf16.msra.mxu0 %v1833_v14 }
 0x215   :  { %1232 = vmatprep.subr.bf16.mxu0 %v1838_v16 }
 0x218   :  { %1233 = vmatpush1.bf16.msra.mxu0 %v1836_v17 }
 0x219   :  { %1234 = vmatprep.subr.bf16.mxu0 %v1841_v18 }
 0x21c   :  { %1235 = vmatpush1.bf16.msra.mxu0 %v1839_v19 }
 0x21d   :  { %1236 = vmatprep.subr.bf16.mxu0 %v1844_v20 }
 0x220   :  { %1237 = vmatpush1.bf16.msra.mxu0 %v1842_v21 }
 0x221   :  { %1238 = vmatprep.subr.bf16.mxu0 %v1847_v22 }
 0x224   :  { %1239 = vmatpush1.bf16.msra.mxu0 %v1845_v23  ;;  %v1893_v23 = vld [vmem:[#allocation13 + $0x48] sm:$0xff]  }
 0x225   :  { %1240 = vmatprep.subr.bf16.mxu0 %v1850_v24  ;;  %v1894_v24 = vld [vmem:[#allocation13 + $0x8] sm:$0xff]  }
 0x228   :  { %1241 = vmatpush1.bf16.msra.mxu0 %v1848_v25  ;;  %v1895_v25 = vld [vmem:[#allocation13 + $0x40] sm:$0xff]  }
 0x229   :  { %1242 = vmatprep.subr.bf16.mxu0 %v1853_v26  ;;  %v1896_v26 = vld [vmem:[#allocation13] sm:$0xff]  }
 0x22c   :  { %1243 = vmatpush1.bf16.msra.mxu0 %v1851_v27  ;;  %v1058_v27 = vld [vmem:[%s2233_s9] sm:$0x3] }
 0x22d   :  { %1244 = vmatprep.subr.bf16.mxu0 %v1856_v28  ;;  %v1063_v28 = vrot.slane %v1058_v27, %v2186_v58  ;;  %v1613_v58 = vld [vmem:[%s2235_s11] ss:$0 sm:$0xff] }
 0x230   :  { %1245 = vmatpush1.bf16.msra.mxu0 %v1854_v29  ;;  %v1067_v29 = vrot.slane %v1058_v27, %v2191_v60 }
 0x231   :  { %1246 = vmatprep.subr.bf16.mxu0 %v1859_v30 }
 0x234   :  { %1247 = vmatpush2.bf16.msra.mxu0 %v1857_v31 }
 0x235   :  { %1248 = vmatprep.subr.bf16.mxu0 %v1862_v32 }
 0x238   :  { %1249 = vmatpush2.bf16.msra.mxu0 %v1860_v33 }
 0x239   :  { %1250 = vmatprep.subr.bf16.mxu0 %v1865_v34 }
 0x23c   :  { %1251 = vmatpush2.bf16.msra.mxu0 %v1863_v35 }
 0x23d   :  { %1252 = vmatprep.subr.bf16.mxu0 %v1868_v36 }
 0x240   :  { %1253 = vmatpush2.bf16.msra.mxu0 %v1866_v37 }
 0x241   :  { %1254 = vmatprep.subr.bf16.mxu0 %v1871_v38 }
 0x244   :  { %1255 = vmatpush2.bf16.msra.mxu0 %v1869_v39 }
 0x245   :  { %1256 = vmatprep.subr.bf16.mxu0 %v1874_v40 }
 0x248   :  { %1257 = vmatpush2.bf16.msra.mxu0 %v1872_v41 }
 0x249   :  { %1258 = vmatprep.subr.bf16.mxu0 %v1877_v55 }
 0x24c   :  { %1259 = vmatpush2.bf16.msra.mxu0 %v1875_v56 }
 0x24d   :  { %1260 = vmatprep.subr.bf16.mxu0 %v1880_v57 }
 0x250   :  { %1261 = vmatpush2.bf16.msra.mxu0 %v1878_v59 }
 0x2d3   :  { %v766_v45 = vpop.f32.mrf.mxu0 }
 0x2d4   :  { %v767_v46 = vadd.f32 %v766_v45, %v565_v43 }
 0x2d5   :  { %v768_v47 = vpop.f32.mrf.mxu0 }
 0x2d6   :  { %v769_v48 = vadd.f32 %v768_v47, %v569_v44  ;;  %v773_v49 = vpack.c.bf16 %v767_v46, %v767_v46 }
 0x2d7   :  { %v770_v50 = vpop.f32.mrf.mxu0 }
 0x2d8   :  { %v774_v51 = vpack.c.bf16 %v769_v48, %v769_v48  ;;  %v775_v54 = vmax.bf16 %v2082_v0, %v773_v49 }
 0x2d9   :  { %v771_v52 = vpop.f32.mrf.mxu0 }
 0x2da   :  { %v776_v53 = vmax.bf16 %v2082_v0, %v774_v51 }
 0x2dc   :  { %1013 = vmatprep.mubr.bf16.mxu1 %v776_v53 }
 0x2dd   :  { %1014 = vmatmul.mubr.bf16.vlgmr.msra.gmra.mxu1 %v775_v54 }
 0x2de   :  { %1631 = vmatpush3.bf16.msra.mxu1 %v1882_v62 }
 0x2df   :  { %1632 = vmatprep.subr.bf16.mxu1 %v1883_v63 }
 0x2e2   :  { %1633 = vmatpush3.bf16.msra.mxu1 %v1884_v1 }
 0x2e3   :  { %1634 = vmatprep.subr.bf16.mxu1 %v1885_v2 }
 0x2e6   :  { %1635 = vmatpush3.bf16.msra.mxu1 %v1886_v3 }
 0x2e7   :  { %1636 = vmatprep.subr.bf16.mxu1 %v1887_v4 }
 0x2ea   :  { %1637 = vmatpush3.bf16.msra.mxu1 %v1888_v5 }
 0x2eb   :  { %1638 = vmatprep.subr.bf16.mxu1 %v1889_v6 }
 0x2ee   :  { %1639 = vmatpush3.bf16.msra.mxu1 %v1890_v7 }
 0x2ef   :  { %1640 = vmatprep.subr.bf16.mxu1 %v1891_v8 }
 0x2f2   :  { %1641 = vmatpush3.bf16.msra.mxu1 %v1892_v9 }
 0x2f3   :  { %1642 = vmatprep.subr.bf16.mxu1 %v1893_v23 }
 0x2f6   :  { %1643 = vmatpush3.bf16.msra.mxu1 %v1894_v24 }
 0x2f7   :  { %1644 = vmatprep.subr.bf16.mxu1 %v1895_v25 }
 0x2fa   :  { %1645 = vmatpush3.bf16.msra.mxu1 %v1896_v26 }
 0x39d   :  { %v1015_v13 = vpop.f32.mrf.mxu1 }
 0x39e   :  { %v1016_v14 = vadd.f32 %v1015_v13, %v814_v11 }
 0x39f   :  { %v1017_v15 = vpop.f32.mrf.mxu1 }
 0x3a0   :  { %v1018_v16 = vadd.f32 %v1017_v15, %v818_v12  ;;  %v1022_v17 = vpack.c.bf16 %v1016_v14, %v1016_v14 }
 0x3a1   :  { %v1019_v18 = vpop.f32.mrf.mxu1 }
 0x3a2   :  { %v1023_v19 = vpack.c.bf16 %v1018_v16, %v1018_v16  ;;  %v1024_v22 = vmax.bf16 %v2082_v0, %v1022_v17 }
 0x3a3   :  { %v1020_v20 = vpop.f32.mrf.mxu1 }
 0x3a4   :  { %v1025_v21 = vmax.bf16 %v2082_v0, %v1023_v19 }
 0x3a6   :  { %1262 = vmatprep.mubr.bf16.mxu0 %v1025_v21 }
 0x3a7   :  { %1263 = vmatmul.mubr.bf16.vlgmr.msra.gmra.mxu0 %v1024_v22 }
 0x467   :  { %v1264_v30 = vpop.f32.mrf.mxu0 }
 0x468   :  { %v1265_v31 = vadd.f32 %v1264_v30, %v1063_v28 }
 0x469   :  { %v1266_v32 = vpop.f32.mrf.mxu0 }
 0x46a   :  { %v1267_v33 = vadd.f32 %v1266_v32, %v1067_v29  ;;  %v1271_v34 = vpack.c.bf16 %v1265_v31, %v1265_v31 }
 0x46b   :  { %v1268_v35 = vpop.f32.mrf.mxu0 }
 0x46c   :  { %v1272_v36 = vpack.c.bf16 %v1267_v33, %v1267_v33  ;;  %v1273_v39 = vmax.bf16 %v2082_v0, %v1271_v34 }
 0x46d   :  { %v1269_v37 = vpop.f32.mrf.mxu0 }
 0x46e   :  { %v1274_v38 = vmax.bf16 %v2082_v0, %v1272_v36 }
 0x470   :  { %1442 = vmatprep.mubr.bf16.mxu1 %v1274_v38 }
 0x471   :  { %1443 = vmatmul.mubr.bf16.vlgmr.msra.gmra.mxu1 %v1273_v39 }
 0x531   :  { %v1646_v40 = vpop.f32.mrf.mxu1 }
 0x533   :  { %v1647_v60 = vpop.f32.mrf.mxu1 }
 0x534   :  { %v1648_v41 = vadd.f32 %v1647_v60, %v1646_v40 }
 0x535   :  { %v1649_v42 = vpop.f32.mrf.mxu1 }
 0x536   :  { %v1445_v43 = vadd.f32 %v1648_v41, %v1613_v58 }
 0x537   :  { %v1650_v44 = vpop.f32.mrf.mxu1 }
 0x538   :  { %1450 = vst [vmem:[#allocation14] sm:$0xff] %v1445_v43 }
 0x539   :  { %2052 = shalt.err (!%p2049_p11)
}
 0x53a   :  { %1460 = dma.vmem_to_hbm [thread:$0]  %s1458_s22, 128, %s2236_s12, [#allocation4]  }
 0x53b   :  { %2069 = dma.done.wait [#allocation4], 128  }
 0x53c   :  { %2070 = vsyncadd [#allocation4], 4294967168 }
 0x53d   :  { %1464 = vsyncpa [#allocation3], 1 }
 0x53e   :  { %1465 = vsyncpa [#allocation6], 1 }
 0x53f   :  { %1466 = vsyncpa [#allocation9], 1 }
 0x540   :  { %1467 = vsyncpa [#allocation12], 1 }
 0x541   :  { %1468 = vsyncpa [#allocation4], 1 }

</bundles_post_ra>
